<compile_context>
chip_gen: v5e
topology: v5e:2x2
jax: 0.10.0
libtpu: 0.0.40
codegen_flags: <defaults>
</compile_context>

<pallas_src>
import math

import jax
import jax.numpy as jnp
from jax.experimental import pallas as pl
from jax.experimental.pallas import tpu as pltpu


def mlp_kernel(x_ref,
               w1, b1, w2, b2, w3, b3, w4, b4,
               wo, bo,
               o_ref):
    x = x_ref[...]                       # bf16 [TM, D_in]

    def dense_relu(h_bf16, w_ref, b_ref):
        # MXU matmul in bf16, f32 accumulate; bias+ReLU epilogue in f32 (VPU).
        y = jnp.dot(h_bf16, w_ref[...], preferred_element_type=jnp.float32)
        y = y + b_ref[...]
        return jnp.maximum(y, 0.0)

    h = dense_relu(x, w1, b1)                            # [TM, 512] = [x1_256 | x2_256]
    h = dense_relu(h.astype(jnp.bfloat16), w2, b2)       # [TM, 256] = [x1_128 | x2_128]
    h = dense_relu(h.astype(jnp.bfloat16), w3, b3)       # [TM, 128] = [x1_64  | x2_64 ]
    h = dense_relu(h.astype(jnp.bfloat16), w4, b4)       # [TM, 64]  = [x1_32  | x2_32 ]

    out = jnp.dot(h.astype(jnp.bfloat16), wo[...],
                  preferred_element_type=jnp.float32) + bo[...]
    o_ref[...] = out                                     # [TM, 3] f32


def init_params(key, input_shape):
    """PyTorch-style uniform(-1/sqrt(fan_in), 1/sqrt(fan_in)) init.

    Weights stored as [in, out] (transposed vs. torch's [out, in]).
    """
    dims = [
        (input_shape, 256), (256, 128), (128, 64), (64, 32),   # d1..d4
        (input_shape, 256), (256, 128), (128, 64), (64, 32),   # d5..d8
        (64, 3),                                                # out
    ]
    params = []
    for (fan_in, fan_out) in dims:
        key, kw, kb = jax.random.split(key, 3)
        bound = 1.0 / (fan_in ** 0.5)
        w = jax.random.uniform(kw, (fan_in, fan_out), jnp.float32, -bound, bound)
        b = jax.random.uniform(kb, (1, fan_out), jnp.float32, -bound, bound)
        params.append((w, b))
    return params


def _block_diag(a, b):
    za = jnp.zeros((a.shape[0], b.shape[1]), a.dtype)
    zb = jnp.zeros((b.shape[0], a.shape[1]), b.dtype)
    top = jnp.concatenate([a, za], axis=1)
    bot = jnp.concatenate([zb, b], axis=1)
    return jnp.concatenate([top, bot], axis=0)


def pack_params(params):
    """Fuse the two branches into a single chain of (bf16 weight, f32 bias)."""
    (w1, b1), (w2, b2), (w3, b3), (w4, b4), \
        (w5, b5), (w6, b6), (w7, b7), (w8, b8), (wo, bo) = params

    W1 = jnp.concatenate([w1, w5], axis=1)          # [D_in, 512]
    B1 = jnp.concatenate([b1, b5], axis=1)          # [1, 512]
    W2 = _block_diag(w2, w6)                        # [512, 256]
    B2 = jnp.concatenate([b2, b6], axis=1)          # [1, 256]
    W3 = _block_diag(w3, w7)                        # [256, 128]
    B3 = jnp.concatenate([b3, b7], axis=1)          # [1, 128]
    W4 = _block_diag(w4, w8)                        # [128, 64]
    B4 = jnp.concatenate([b4, b8], axis=1)          # [1, 64]

    bf = lambda w: w.astype(jnp.bfloat16)
    return (bf(W1), B1, bf(W2), B2, bf(W3), B3, bf(W4), B4, bf(wo), bo)


def _round_up(n, m):
    return ((n + m - 1) // m) * m


def model_forward(x, params):
    B, D_in = x.shape
    packed = pack_params(params)

    # Pad batch to a multiple of 8 sublanes; tile up to 256 rows per grid step.
    b_pad8 = _round_up(B, 8)
    block_m = 256 if b_pad8 >= 256 else b_pad8
    B_pad = _round_up(b_pad8, block_m)

    x_bf = x.astype(jnp.bfloat16)
    if B_pad != B:
        x_bf = jnp.pad(x_bf, ((0, B_pad - B), (0, 0)))

    grid = (B_pad // block_m,)

    # x / out are tiled over the batch grid; weights & biases use full-array
    # blocks with constant index_maps so they stay VMEM-resident.
    x_spec = pl.BlockSpec((block_m, D_in), lambda i: (i, 0))
    out_spec = pl.BlockSpec((block_m, 3), lambda i: (i, 0))

    def const_spec(arr):
        return pl.BlockSpec(arr.shape, lambda i: (0,) * arr.ndim)

    in_specs = [x_spec] + [const_spec(a) for a in packed]

    out_pad = pl.pallas_call(
        mlp_kernel,
        out_shape=jax.ShapeDtypeStruct((B_pad, 3), jnp.float32),
        grid=grid,
        in_specs=in_specs,
        out_specs=out_spec,
        compiler_params=pltpu.CompilerParams(
            dimension_semantics=("parallel",)),
    )(x_bf, *packed)

    return out_pad[:B]


def reference_forward(x, params):
    """Pure-JAX f32 reference matching the original PyTorch forward."""
    (w1, b1), (w2, b2), (w3, b3), (w4, b4), \
        (w5, b5), (w6, b6), (w7, b7), (w8, b8), (wo, bo) = params
    relu = lambda v: jnp.maximum(v, 0.0)
    x1 = relu(x @ w1 + b1)
    x1 = relu(x1 @ w2 + b2)
    x1 = relu(x1 @ w3 + b3)
    x1 = relu(x1 @ w4 + b4)
    x2 = relu(x @ w5 + b5)
    x2 = relu(x2 @ w6 + b6)
    x2 = relu(x2 @ w7 + b7)
    x2 = relu(x2 @ w8 + b8)
    h = jnp.concatenate([x1, x2], axis=1)
    return h @ wo + bo


if __name__ == "__main__":
    key = jax.random.PRNGKey(0)
    input_shape = 16   # feature dim of the Linear input
    batch = 4

    key, kx, kp = jax.random.split(key, 3)
    x = jax.random.normal(kx, (batch, input_shape), jnp.float32)
    params = init_params(kp, input_shape)

    out = model_forward(x, params)
    out = jax.block_until_ready(out)

    ref = reference_forward(x, params)
    assert out.shape == (batch, 3)
    # bf16 MXU inputs -> compare against the f32 reference with a looser tol.
    assert jnp.allclose(out, ref, atol=2e-2, rtol=2e-2), "mismatch vs reference"
    print("KERNEL_OK")
</pallas_src>

<mosaic_0001>
module attributes {stable_mosaic.version = 11 : i64} {
  func.func @mlp_kernel(%arg0: i32, %arg1: memref<8x16xbf16, #tpu.memory_space<vmem>>, %arg2: memref<16x512xbf16, #tpu.memory_space<vmem>>, %arg3: memref<1x512xf32, #tpu.memory_space<vmem>>, %arg4: memref<512x256xbf16, #tpu.memory_space<vmem>>, %arg5: memref<1x256xf32, #tpu.memory_space<vmem>>, %arg6: memref<256x128xbf16, #tpu.memory_space<vmem>>, %arg7: memref<1x128xf32, #tpu.memory_space<vmem>>, %arg8: memref<128x64xbf16, #tpu.memory_space<vmem>>, %arg9: memref<1x64xf32, #tpu.memory_space<vmem>>, %arg10: memref<64x3xbf16, #tpu.memory_space<vmem>>, %arg11: memref<1x3xf32, #tpu.memory_space<vmem>>, %arg12: memref<8x3xf32, #tpu.memory_space<vmem>>) attributes {dimension_semantics = [#tpu.dimension_semantics<parallel>], iteration_bounds = array<i64: 1>, scalar_prefetch = 0 : i64, scratch_operands = 0 : i64, tpu.core_type = #tpu.core_type<tc>, window_params = [{transform_indices = @transform_0, window_bounds = array<i64: 8, 16>}, {pipeline_mode = #tpu.pipeline_mode<synchronous>, transform_indices = @transform_1, window_bounds = array<i64: 16, 512>}, {pipeline_mode = #tpu.pipeline_mode<synchronous>, transform_indices = @transform_2, window_bounds = array<i64: 1, 512>}, {pipeline_mode = #tpu.pipeline_mode<synchronous>, transform_indices = @transform_3, window_bounds = array<i64: 512, 256>}, {pipeline_mode = #tpu.pipeline_mode<synchronous>, transform_indices = @transform_4, window_bounds = array<i64: 1, 256>}, {pipeline_mode = #tpu.pipeline_mode<synchronous>, transform_indices = @transform_5, window_bounds = array<i64: 256, 128>}, {pipeline_mode = #tpu.pipeline_mode<synchronous>, transform_indices = @transform_6, window_bounds = array<i64: 1, 128>}, {pipeline_mode = #tpu.pipeline_mode<synchronous>, transform_indices = @transform_7, window_bounds = array<i64: 128, 64>}, {pipeline_mode = #tpu.pipeline_mode<synchronous>, transform_indices = @transform_8, window_bounds = array<i64: 1, 64>}, {pipeline_mode = #tpu.pipeline_mode<synchronous>, transform_indices = @transform_9, window_bounds = array<i64: 64, 3>}, {pipeline_mode = #tpu.pipeline_mode<synchronous>, transform_indices = @transform_10, window_bounds = array<i64: 1, 3>}, {transform_indices = @transform_11, window_bounds = array<i64: 8, 3>}]} {
    %c0 = arith.constant 0 : index
    %c0_0 = arith.constant 0 : index
    %0 = vector.load %arg1[%c0, %c0_0] : memref<8x16xbf16, #tpu.memory_space<vmem>>, vector<8x16xbf16>
    %c0_1 = arith.constant 0 : index
    %c0_2 = arith.constant 0 : index
    %1 = vector.load %arg2[%c0_1, %c0_2] : memref<16x512xbf16, #tpu.memory_space<vmem>>, vector<16x512xbf16>
    %cst = arith.constant dense<0.000000e+00> : vector<8x512xf32>
    %2 = tpu.matmul %0, %1, %cst {dimension_numbers = #tpu.dot_dimension_numbers<[1], [0], [0], [1], [0, 0, 1, 1], [], []>} : vector<8x16xbf16>, vector<16x512xbf16>, vector<8x512xf32> -> vector<8x512xf32>
    %c0_3 = arith.constant 0 : index
    %c0_4 = arith.constant 0 : index
    %3 = vector.load %arg3[%c0_3, %c0_4] : memref<1x512xf32, #tpu.memory_space<vmem>>, vector<1x512xf32>
    %4 = vector.broadcast %3 : vector<1x512xf32> to vector<8x512xf32>
    %5 = arith.addf %2, %4 : vector<8x512xf32>
    %cst_5 = arith.constant 0.000000e+00 : f32
    %6 = vector.broadcast %cst_5 : f32 to vector<8x512xf32>
    %7 = arith.maximumf %5, %6 : vector<8x512xf32>
    %8 = arith.truncf %7 : vector<8x512xf32> to vector<8x512xbf16>
    %c0_6 = arith.constant 0 : index
    %c0_7 = arith.constant 0 : index
    %9 = vector.load %arg4[%c0_6, %c0_7] : memref<512x256xbf16, #tpu.memory_space<vmem>>, vector<512x256xbf16>
    %cst_8 = arith.constant dense<0.000000e+00> : vector<8x256xf32>
    %10 = tpu.matmul %8, %9, %cst_8 {dimension_numbers = #tpu.dot_dimension_numbers<[1], [0], [0], [1], [0, 0, 1, 1], [], []>} : vector<8x512xbf16>, vector<512x256xbf16>, vector<8x256xf32> -> vector<8x256xf32>
    %c0_9 = arith.constant 0 : index
    %c0_10 = arith.constant 0 : index
    %11 = vector.load %arg5[%c0_9, %c0_10] : memref<1x256xf32, #tpu.memory_space<vmem>>, vector<1x256xf32>
    %12 = vector.broadcast %11 : vector<1x256xf32> to vector<8x256xf32>
    %13 = arith.addf %10, %12 : vector<8x256xf32>
    %cst_11 = arith.constant 0.000000e+00 : f32
    %14 = vector.broadcast %cst_11 : f32 to vector<8x256xf32>
    %15 = arith.maximumf %13, %14 : vector<8x256xf32>
    %16 = arith.truncf %15 : vector<8x256xf32> to vector<8x256xbf16>
    %c0_12 = arith.constant 0 : index
    %c0_13 = arith.constant 0 : index
    %17 = vector.load %arg6[%c0_12, %c0_13] : memref<256x128xbf16, #tpu.memory_space<vmem>>, vector<256x128xbf16>
    %cst_14 = arith.constant dense<0.000000e+00> : vector<8x128xf32>
    %18 = tpu.matmul %16, %17, %cst_14 {dimension_numbers = #tpu.dot_dimension_numbers<[1], [0], [0], [1], [0, 0, 1, 1], [], []>} : vector<8x256xbf16>, vector<256x128xbf16>, vector<8x128xf32> -> vector<8x128xf32>
    %c0_15 = arith.constant 0 : index
    %c0_16 = arith.constant 0 : index
    %19 = vector.load %arg7[%c0_15, %c0_16] : memref<1x128xf32, #tpu.memory_space<vmem>>, vector<1x128xf32>
    %20 = vector.broadcast %19 : vector<1x128xf32> to vector<8x128xf32>
    %21 = arith.addf %18, %20 : vector<8x128xf32>
    %cst_17 = arith.constant 0.000000e+00 : f32
    %22 = vector.broadcast %cst_17 : f32 to vector<8x128xf32>
    %23 = arith.maximumf %21, %22 : vector<8x128xf32>
    %24 = arith.truncf %23 : vector<8x128xf32> to vector<8x128xbf16>
    %c0_18 = arith.constant 0 : index
    %c0_19 = arith.constant 0 : index
    %25 = vector.load %arg8[%c0_18, %c0_19] : memref<128x64xbf16, #tpu.memory_space<vmem>>, vector<128x64xbf16>
    %cst_20 = arith.constant dense<0.000000e+00> : vector<8x64xf32>
    %26 = tpu.matmul %24, %25, %cst_20 {dimension_numbers = #tpu.dot_dimension_numbers<[1], [0], [0], [1], [0, 0, 1, 1], [], []>} : vector<8x128xbf16>, vector<128x64xbf16>, vector<8x64xf32> -> vector<8x64xf32>
    %c0_21 = arith.constant 0 : index
    %c0_22 = arith.constant 0 : index
    %27 = vector.load %arg9[%c0_21, %c0_22] : memref<1x64xf32, #tpu.memory_space<vmem>>, vector<1x64xf32>
    %28 = vector.broadcast %27 : vector<1x64xf32> to vector<8x64xf32>
    %29 = arith.addf %26, %28 : vector<8x64xf32>
    %cst_23 = arith.constant 0.000000e+00 : f32
    %30 = vector.broadcast %cst_23 : f32 to vector<8x64xf32>
    %31 = arith.maximumf %29, %30 : vector<8x64xf32>
    %32 = arith.truncf %31 : vector<8x64xf32> to vector<8x64xbf16>
    %c0_24 = arith.constant 0 : index
    %c0_25 = arith.constant 0 : index
    %33 = vector.load %arg10[%c0_24, %c0_25] : memref<64x3xbf16, #tpu.memory_space<vmem>>, vector<64x3xbf16>
    %cst_26 = arith.constant dense<0.000000e+00> : vector<8x3xf32>
    %34 = tpu.matmul %32, %33, %cst_26 {dimension_numbers = #tpu.dot_dimension_numbers<[1], [0], [0], [1], [0, 0, 1, 1], [], []>} : vector<8x64xbf16>, vector<64x3xbf16>, vector<8x3xf32> -> vector<8x3xf32>
    %c0_27 = arith.constant 0 : index
    %c0_28 = arith.constant 0 : index
    %35 = vector.load %arg11[%c0_27, %c0_28] : memref<1x3xf32, #tpu.memory_space<vmem>>, vector<1x3xf32>
    %36 = vector.broadcast %35 : vector<1x3xf32> to vector<8x3xf32>
    %37 = arith.addf %34, %36 : vector<8x3xf32>
    %c0_29 = arith.constant 0 : index
    %c0_30 = arith.constant 0 : index
    %38 = vector.load %arg12[%c0_29, %c0_30] : memref<8x3xf32, #tpu.memory_space<vmem>>, vector<8x3xf32>
    tpu.vector_store %arg12[%c0_29, %c0_30], %37 {strides = array<i32>} : memref<8x3xf32, #tpu.memory_space<vmem>>, vector<8x3xf32>,
    return
  }
  func.func @transform_0(%arg0: i32) -> (i32, i32) {
    %c0_i32 = arith.constant 0 : i32
    %c0_i32_0 = arith.constant 0 : i32
    return %arg0, %c0_i32 : i32, i32
  }
  func.func @transform_1(%arg0: i32) -> (i32, i32) {
    %c0_i32 = arith.constant 0 : i32
    %c0_i32_0 = arith.constant 0 : i32
    %c0_i32_1 = arith.constant 0 : i32
    return %c0_i32, %c0_i32_0 : i32, i32
  }
  func.func @transform_2(%arg0: i32) -> (i32, i32) {
    %c0_i32 = arith.constant 0 : i32
    %c0_i32_0 = arith.constant 0 : i32
    %c0_i32_1 = arith.constant 0 : i32
    return %c0_i32, %c0_i32_0 : i32, i32
  }
  func.func @transform_3(%arg0: i32) -> (i32, i32) {
    %c0_i32 = arith.constant 0 : i32
    %c0_i32_0 = arith.constant 0 : i32
    %c0_i32_1 = arith.constant 0 : i32
    return %c0_i32, %c0_i32_0 : i32, i32
  }
  func.func @transform_4(%arg0: i32) -> (i32, i32) {
    %c0_i32 = arith.constant 0 : i32
    %c0_i32_0 = arith.constant 0 : i32
    %c0_i32_1 = arith.constant 0 : i32
    return %c0_i32, %c0_i32_0 : i32, i32
  }
  func.func @transform_5(%arg0: i32) -> (i32, i32) {
    %c0_i32 = arith.constant 0 : i32
    %c0_i32_0 = arith.constant 0 : i32
    %c0_i32_1 = arith.constant 0 : i32
    return %c0_i32, %c0_i32_0 : i32, i32
  }
  func.func @transform_6(%arg0: i32) -> (i32, i32) {
    %c0_i32 = arith.constant 0 : i32
    %c0_i32_0 = arith.constant 0 : i32
    %c0_i32_1 = arith.constant 0 : i32
    return %c0_i32, %c0_i32_0 : i32, i32
  }
  func.func @transform_7(%arg0: i32) -> (i32, i32) {
    %c0_i32 = arith.constant 0 : i32
    %c0_i32_0 = arith.constant 0 : i32
    %c0_i32_1 = arith.constant 0 : i32
    return %c0_i32, %c0_i32_0 : i32, i32
  }
  func.func @transform_8(%arg0: i32) -> (i32, i32) {
    %c0_i32 = arith.constant 0 : i32
    %c0_i32_0 = arith.constant 0 : i32
    %c0_i32_1 = arith.constant 0 : i32
    return %c0_i32, %c0_i32_0 : i32, i32
  }
  func.func @transform_9(%arg0: i32) -> (i32, i32) {
    %c0_i32 = arith.constant 0 : i32
    %c0_i32_0 = arith.constant 0 : i32
    %c0_i32_1 = arith.constant 0 : i32
    return %c0_i32, %c0_i32_0 : i32, i32
  }
  func.func @transform_10(%arg0: i32) -> (i32, i32) {
    %c0_i32 = arith.constant 0 : i32
    %c0_i32_0 = arith.constant 0 : i32
    %c0_i32_1 = arith.constant 0 : i32
    return %c0_i32, %c0_i32_0 : i32, i32
  }
  func.func @transform_11(%arg0: i32) -> (i32, i32) {
    %c0_i32 = arith.constant 0 : i32
    %c0_i32_0 = arith.constant 0 : i32
    return %arg0, %c0_i32 : i32, i32
  }
}

</mosaic_0001>

<bundles_post_ra>
// kernel: tpu_custom_call.1
= control target key start
LH: loop header
LB: loop body
LE: loop exit
PB: predicated region body
PF: predicated region fallthrough
CT: control target
= control target key end

     0   :  { %16 = vsyncpa [#allocation3], 0  ;;  %s1675_s0 = inlined_call_operand.vmem [shape: bf16[8,16], index: 0, kind: input, shape index: {}]   ;;  %s1676_s1 = inlined_call_operand.vmem [shape: bf16[16,512], index: 1, kind: input, shape index: {}]   ;;  %s1677_s2 = inlined_call_operand.vmem [shape: f32[1,512], index: 2, kind: input, shape index: {}]   ;;  %s1678_s3 = inlined_call_operand.hbm [shape: bf16[512,256], index: 3, kind: input, shape index: {}]   ;;  %s1679_s4 = inlined_call_operand.vmem [shape: f32[1,256], index: 4, kind: input, shape index: {}]   ;;  %s1680_s5 = inlined_call_operand.hbm [shape: bf16[256,128], index: 5, kind: input, shape index: {}]   ;;  %s1681_s6 = inlined_call_operand.vmem [shape: f32[1,128], index: 6, kind: input, shape index: {}]   ;;  %s1682_s7 = inlined_call_operand.vmem [shape: bf16[128,64], index: 7, kind: input, shape index: {}]   ;;  %s1683_s8 = inlined_call_operand.vmem [shape: f32[1,64], index: 8, kind: input, shape index: {}]   ;;  %s1684_s9 = inlined_call_operand.vmem [shape: bf16[64,3], index: 9, kind: input, shape index: {}]   ;;  %s1685_s10 = inlined_call_operand.vmem [shape: f32[1,3], index: 10, kind: input, shape index: {}]   ;;  %s1686_s11 = inlined_call_operand.vmem [shape: f32[8,3], index: 11, kind: output, shape index: {}]  }
   0x1   :  { %s28_s19 = sshll.u32 %s1678_s3, 4  ;;  %s29_s19 = int_to_ptr.hbm [resolvable:$true] %s28_s19 }
   0x2   :  { %17 = vsyncpa [#allocation5], 0  ;;  %s1518_s20 = smov [#allocation2]   ;;  %s43_s24 = sshll.u32 %s1680_s5, 4  ;;  %s44_s24 = int_to_ptr.hbm [resolvable:$true] %s43_s24 }
   0x3   :  { %s30_s21 = sshll.u32 %s1518_s20, 4  ;;  %s1519_s25 = smov 128   ;;  %s31_s21 = int_to_ptr.vmem [resolvable:$true] %s30_s21 }
   0x4   :  { %s1520_s26 = smov 8   ;;  %s1521_s27 = smov [#allocation4]  }
   0x5   :  { %36 = dma.hbm_to_vmem [thread:$0]  %s29_s19, 8192, %s31_s21, [#allocation3], %s1519_s25, %s1519_s25, %s1520_s26  }
   0x6   :  { %s45_s28 = sshll.u32 %s1521_s27, 4  ;;  %s1522_s29 = smov 64   ;;  %s46_s28 = int_to_ptr.vmem [resolvable:$true] %s45_s28 }
   0x7   :  { %s1523_s30 = smov 4  }
   0x8   :  { %51 = dma.hbm_to_vmem [thread:$0]  %s44_s24, 2048, %s46_s28, [#allocation5], %s1522_s29, %s1522_s29, %s1523_s30  }
   0x9   :  { %1514 = dma.done.wait [#allocation3], 8192  }
   0xa   :  { %1515 = vsyncadd [#allocation3], 4294959104 }
   0xb   :  { %1516 = dma.done.wait [#allocation5], 2048  }
   0xc   :  { %1517 = vsyncadd [#allocation5], 4294965248  ;;  %vm106_vm0 = vcmask 130048   ;;  %v974_v0 = vld [vmem:[%s1676_s1] sm:$0xf]  ;;  %vm947_vm1 = vcmask 523264  }
   0xd   :  { %v1363_v1 = vld [vmem:[%s1676_s1 + $0xc] sm:$0xf0]  ;;  %v1361_v2 = vld [vmem:[%s1676_s1 + $0x4] sm:$0xf]  ;;  %v976_v4 = vld [vmem:[%s1676_s1 + $0x10] sm:$0xf0] }
   0xe   :  { %v975_v3 = vor.u32 %v1363_v1, %v974_v0  ;;  %v982_v5 = vld [vmem:[%s1676_s1 + $0x8] sm:$0xf]  ;;  %v1364_v6 = vld [vmem:[%s1676_s1 + $0x14] sm:$0xf0]  ;;  %v979_v7 = vor.u32 %v1361_v2, %v976_v4  ;;  %v1362_v9 = vld [vmem:[%s1676_s1 + $0xc] sm:$0xf] }
   0xf   :  { %v983_v8 = vor.u32 %v1364_v6, %v982_v5  ;;  %v984_v10 = vld [vmem:[%s1676_s1 + $0x18] sm:$0xf0]  ;;  %v71_v11 = vld [vmem:[%s1675_s0] sm:$0xf]  ;;  %v1050_v13 = vld [vmem:[#allocation2 + $0x70] sm:$0xf] }
  0x10   :  { %117 = vmatpush.bf16.msra.mxu0 %v975_v3  ;;  %v987_v12 = vor.u32 %v1362_v9, %v984_v10  ;;  %v1380_v14 = vld [vmem:[#allocation2 + $0x74] sm:$0xf0]  ;;  %v1114_v15 = vld [vmem:[#allocation2 + $0xf0] sm:$0xf]  ;;  %130 = vmatpush.bf16.msra.mxu1 %v979_v7  ;;  %v1042_v18 = vld [vmem:[#allocation2 + $0x60] sm:$0xf] }
  0x11   :  { %143 = vmatpush.bf16.msra.mxu2 %v983_v8  ;;  %v1051_v16 = vor.u32 %v1380_v14, %v1050_v13  ;;  %v1396_v17 = vld [vmem:[#allocation2 + $0xf4] sm:$0xf0]  ;;  %v1378_v19 = vld [vmem:[#allocation2 + $0x64] sm:$0xf0]  ;;  %v1106_v21 = vld [vmem:[#allocation2 + $0xe0] sm:$0xf] }
  0x12   :  { %156 = vmatpush.bf16.msra.mxu3 %v987_v12  ;;  %v1115_v20 = vor.u32 %v1396_v17, %v1114_v15  ;;  %v1394_v22 = vld [vmem:[#allocation2 + $0xe4] sm:$0xf0]  ;;  %v1178_v23 = vld [vmem:[#allocation2 + $0x170] sm:$0xf]  ;;  %v1412_v24 = vld [vmem:[#allocation2 + $0x174] sm:$0xf0]  ;;  %v1043_v29 = vor.u32 %v1378_v19, %v1042_v18 }
  0x13   :  { %988 = vmatmul.msk.bf16.vlgmr.msra.gmra.mxu0 %vm106_vm0, %v71_v11  ;;  %v1242_v25 = vld [vmem:[#allocation2 + $0x1f0] sm:$0xf]  ;;  %v1428_v26 = vld [vmem:[#allocation2 + $0x1f4] sm:$0xf0]  ;;  %989 = vmatmul.msk.bf16.vlgmr.msra.gmra.mxu1 %vm106_vm0, %v71_v11  ;;  %v1179_v27 = vor.u32 %v1412_v24, %v1178_v23  ;;  %v1170_v31 = vld [vmem:[#allocation2 + $0x160] sm:$0xf]  ;;  %v1107_v33 = vor.u32 %v1394_v22, %v1106_v21 }
  0x14   :  { %990 = vmatmul.msk.bf16.vlgmr.msra.gmra.mxu2 %vm106_vm0, %v71_v11  ;;  %v1243_v28 = vor.u32 %v1428_v26, %v1242_v25  ;;  %560 = vmatpush.bf16.msrb.mxu0 %v1051_v16  ;;  %v1034_v30 = vld [vmem:[#allocation2 + $0x50] sm:$0xf]  ;;  %v1410_v32 = vld [vmem:[#allocation2 + $0x164] sm:$0xf0]  ;;  %v1376_v34 = vld [vmem:[#allocation2 + $0x54] sm:$0xf0] }
  0x15   :  { %991 = vmatmul.msk.bf16.vlgmr.msra.gmra.mxu3 %vm106_vm0, %v71_v11  ;;  %573 = vmatpush.bf16.msrb.mxu1 %v1115_v20  ;;  %v1171_v35 = vor.u32 %v1410_v32, %v1170_v31  ;;  %v1234_v36 = vld [vmem:[#allocation2 + $0x1e0] sm:$0xf]  ;;  %v1426_v37 = vld [vmem:[#allocation2 + $0x1e4] sm:$0xf0]  ;;  %v1098_v38 = vld [vmem:[#allocation2 + $0xd0] sm:$0xf]  ;;  %v1035_v44 = vor.u32 %v1376_v34, %v1034_v30 }
  0x16   :  { %586 = vmatpush.bf16.msrb.mxu2 %v1179_v27  ;;  %599 = vmatpush.bf16.msrb.mxu3 %v1243_v28  ;;  %v1392_v39 = vld [vmem:[#allocation2 + $0xd4] sm:$0xf0]  ;;  %v1235_v40 = vor.u32 %v1426_v37, %v1234_v36  ;;  %v1162_v41 = vld [vmem:[#allocation2 + $0x150] sm:$0xf]  ;;  %v1026_v47 = vld [vmem:[#allocation2 + $0x40] sm:$0xf] }
  0x17   :  { %v1408_v42 = vld [vmem:[#allocation2 + $0x154] sm:$0xf0]  ;;  %v1226_v43 = vld [vmem:[#allocation2 + $0x1d0] sm:$0xf]  ;;  %v1099_v46 = vor.u32 %v1392_v39, %v1098_v38  ;;  %v1374_v48 = vld [vmem:[#allocation2 + $0x44] sm:$0xf0] }
  0x18   :  { %561 = vmatpush.bf16.msrb.mxu0 %v1043_v29  ;;  %v1424_v45 = vld [vmem:[#allocation2 + $0x1d4] sm:$0xf0]  ;;  %v1090_v49 = vld [vmem:[#allocation2 + $0xc0] sm:$0xf]  ;;  %v1163_v50 = vor.u32 %v1408_v42, %v1162_v41  ;;  %v1390_v51 = vld [vmem:[#allocation2 + $0xc4] sm:$0xf0]  ;;  %v1027_v57 = vor.u32 %v1374_v48, %v1026_v47 }
  0x19   :  { %574 = vmatpush.bf16.msrb.mxu1 %v1107_v33  ;;  %v1227_v52 = vor.u32 %v1424_v45, %v1226_v43  ;;  %v1154_v53 = vld [vmem:[#allocation2 + $0x140] sm:$0xf]  ;;  %v1406_v54 = vld [vmem:[#allocation2 + $0x144] sm:$0xf0]  ;;  %v1091_v58 = vor.u32 %v1390_v51, %v1090_v49  ;;  %v1018_v59 = vld [vmem:[#allocation2 + $0x30] sm:$0xf] }
  0x1a   :  { %587 = vmatpush.bf16.msrb.mxu2 %v1171_v35  ;;  %600 = vmatpush.bf16.msrb.mxu3 %v1235_v40  ;;  %v1218_v55 = vld [vmem:[#allocation2 + $0x1c0] sm:$0xf]  ;;  %v1422_v56 = vld [vmem:[#allocation2 + $0x1c4] sm:$0xf0]  ;;  %v1372_v60 = vld [vmem:[#allocation2 + $0x34] sm:$0xf0]  ;;  %v1155_v62 = vor.u32 %v1406_v54, %v1154_v53 }
  0x1b   :  { %v1082_v61 = vld [vmem:[#allocation2 + $0xb0] sm:$0xf]  ;;  %v1388_v63 = vld [vmem:[#allocation2 + $0xb4] sm:$0xf0]  ;;  %v1219_v0 = vor.u32 %v1422_v56, %v1218_v55  ;;  %v1019_v5 = vor.u32 %v1372_v60, %v1018_v59  ;;  %v1010_v7 = vld [vmem:[#allocation2 + $0x20] sm:$0xf] }
  0x1c   :  { %562 = vmatpush.bf16.msrb.mxu0 %v1035_v44  ;;  %v1146_v1 = vld [vmem:[#allocation2 + $0x130] sm:$0xf]  ;;  %v1404_v2 = vld [vmem:[#allocation2 + $0x134] sm:$0xf0]  ;;  %v1083_v6 = vor.u32 %v1388_v63, %v1082_v61  ;;  %v1370_v8 = vld [vmem:[#allocation2 + $0x24] sm:$0xf0] }
  0x1d   :  { %575 = vmatpush.bf16.msrb.mxu1 %v1099_v46  ;;  %v1210_v3 = vld [vmem:[#allocation2 + $0x1b0] sm:$0xf]  ;;  %v1420_v4 = vld [vmem:[#allocation2 + $0x1b4] sm:$0xf0]  ;;  %v1074_v9 = vld [vmem:[#allocation2 + $0xa0] sm:$0xf]  ;;  %v1147_v10 = vor.u32 %v1404_v2, %v1146_v1  ;;  %v1011_v17 = vor.u32 %v1370_v8, %v1010_v7 }
  0x1e   :  { %588 = vmatpush.bf16.msrb.mxu2 %v1163_v50  ;;  %601 = vmatpush.bf16.msrb.mxu3 %v1227_v52  ;;  %v1386_v11 = vld [vmem:[#allocation2 + $0xa4] sm:$0xf0]  ;;  %v1211_v12 = vor.u32 %v1420_v4, %v1210_v3  ;;  %v1138_v13 = vld [vmem:[#allocation2 + $0x120] sm:$0xf]  ;;  %v1002_v19 = vld [vmem:[#allocation2 + $0x10] sm:$0xf] }
  0x1f   :  { %v1402_v14 = vld [vmem:[#allocation2 + $0x124] sm:$0xf0]  ;;  %v1202_v15 = vld [vmem:[#allocation2 + $0x1a0] sm:$0xf]  ;;  %v1075_v18 = vor.u32 %v1386_v11, %v1074_v9  ;;  %v1368_v20 = vld [vmem:[#allocation2 + $0x14] sm:$0xf0] }
  0x20   :  { %563 = vmatpush.bf16.msrb.mxu0 %v1027_v57  ;;  %v1418_v16 = vld [vmem:[#allocation2 + $0x1a4] sm:$0xf0]  ;;  %v1066_v21 = vld [vmem:[#allocation2 + $0x90] sm:$0xf]  ;;  %v1139_v22 = vor.u32 %v1402_v14, %v1138_v13  ;;  %v1384_v23 = vld [vmem:[#allocation2 + $0x94] sm:$0xf0]  ;;  %v1003_v31 = vor.u32 %v1368_v20, %v1002_v19 }
  0x21   :  { %576 = vmatpush.bf16.msrb.mxu1 %v1091_v58  ;;  %v1203_v24 = vor.u32 %v1418_v16, %v1202_v15  ;;  %v1130_v25 = vld [vmem:[#allocation2 + $0x110] sm:$0xf]  ;;  %v1400_v26 = vld [vmem:[#allocation2 + $0x114] sm:$0xf0]  ;;  %v994_v27 = vld [vmem:[#allocation2] sm:$0xf]  ;;  %v1067_v34 = vor.u32 %v1384_v23, %v1066_v21 }
  0x22   :  { %589 = vmatpush.bf16.msrb.mxu2 %v1155_v62  ;;  %602 = vmatpush.bf16.msrb.mxu3 %v1219_v0  ;;  %v1366_v28 = vld [vmem:[#allocation2 + $0x4] sm:$0xf0]  ;;  %v1194_v29 = vld [vmem:[#allocation2 + $0x190] sm:$0xf]  ;;  %v1416_v30 = vld [vmem:[#allocation2 + $0x194] sm:$0xf0]  ;;  %v1131_v36 = vor.u32 %v1400_v26, %v1130_v25 }
  0x23   :  { %v1058_v32 = vld [vmem:[#allocation2 + $0x80] sm:$0xf]  ;;  %v1382_v33 = vld [vmem:[#allocation2 + $0x84] sm:$0xf0]  ;;  %v1379_v35 = vld [vmem:[#allocation2 + $0x74] sm:$0xf]  ;;  %v1195_v40 = vor.u32 %v1416_v30, %v1194_v29  ;;  %v995_v44 = vor.u32 %v1366_v28, %v994_v27 }
  0x24   :  { %564 = vmatpush.bf16.msrb.mxu0 %v1019_v5  ;;  %v1052_v37 = vld [vmem:[#allocation2 + $0x78] sm:$0xf0]  ;;  %v1395_v38 = vld [vmem:[#allocation2 + $0xf4] sm:$0xf]  ;;  %v1122_v41 = vld [vmem:[#allocation2 + $0x100] sm:$0xf]  ;;  %v1059_v48 = vor.u32 %v1382_v33, %v1058_v32 }
  0x25   :  { %577 = vmatpush.bf16.msrb.mxu1 %v1083_v6  ;;  %v1116_v39 = vld [vmem:[#allocation2 + $0xf8] sm:$0xf0]  ;;  %v1398_v42 = vld [vmem:[#allocation2 + $0x104] sm:$0xf0]  ;;  %v1186_v43 = vld [vmem:[#allocation2 + $0x180] sm:$0xf]  ;;  %v1055_v49 = vor.u32 %v1379_v35, %v1052_v37 }
  0x26   :  { %590 = vmatpush.bf16.msrb.mxu2 %v1147_v10  ;;  %603 = vmatpush.bf16.msrb.mxu3 %v1211_v12  ;;  %v1414_v45 = vld [vmem:[#allocation2 + $0x184] sm:$0xf0]  ;;  %v1411_v46 = vld [vmem:[#allocation2 + $0x174] sm:$0xf]  ;;  %v1180_v47 = vld [vmem:[#allocation2 + $0x178] sm:$0xf0]  ;;  %v1119_v52 = vor.u32 %v1395_v38, %v1116_v39  ;;  %v1123_v55 = vor.u32 %v1398_v42, %v1122_v41 }
  0x27   :  { %v1427_v50 = vld [vmem:[#allocation2 + $0x1f4] sm:$0xf]  ;;  %v1244_v51 = vld [vmem:[#allocation2 + $0x1f8] sm:$0xf0]  ;;  %v1377_v53 = vld [vmem:[#allocation2 + $0x64] sm:$0xf]  ;;  %v1187_v58 = vor.u32 %v1414_v45, %v1186_v43  ;;  %v1183_v59 = vor.u32 %v1411_v46, %v1180_v47 }
  0x28   :  { %565 = vmatpush.bf16.msrb.mxu0 %v1011_v17  ;;  %v1044_v54 = vld [vmem:[#allocation2 + $0x68] sm:$0xf0]  ;;  %v1393_v56 = vld [vmem:[#allocation2 + $0xe4] sm:$0xf]  ;;  %v1247_v60 = vor.u32 %v1427_v50, %v1244_v51  ;;  %v1375_v63 = vld [vmem:[#allocation2 + $0x54] sm:$0xf] }
  0x29   :  { %578 = vmatpush.bf16.msrb.mxu1 %v1075_v18  ;;  %v1108_v57 = vld [vmem:[#allocation2 + $0xe8] sm:$0xf0]  ;;  %v1047_v61 = vor.u32 %v1377_v53, %v1044_v54  ;;  %v1036_v0 = vld [vmem:[#allocation2 + $0x58] sm:$0xf0]  ;;  %v1391_v1 = vld [vmem:[#allocation2 + $0xd4] sm:$0xf] }
  0x2a   :  { %591 = vmatpush.bf16.msrb.mxu2 %v1139_v22  ;;  %604 = vmatpush.bf16.msrb.mxu3 %v1203_v24  ;;  %v1111_v62 = vor.u32 %v1393_v56, %v1108_v57  ;;  %v1039_v2 = vor.u32 %v1375_v63, %v1036_v0  ;;  %v1100_v3 = vld [vmem:[#allocation2 + $0xd8] sm:$0xf0]  ;;  %v1409_v5 = vld [vmem:[#allocation2 + $0x164] sm:$0xf]  ;;  %v1172_v6 = vld [vmem:[#allocation2 + $0x168] sm:$0xf0] }
  0x2b   :  { %v1103_v4 = vor.u32 %v1391_v1, %v1100_v3  ;;  %v1175_v7 = vor.u32 %v1409_v5, %v1172_v6  ;;  %v1425_v8 = vld [vmem:[#allocation2 + $0x1e4] sm:$0xf]  ;;  %v1236_v9 = vld [vmem:[#allocation2 + $0x1e8] sm:$0xf0]  ;;  %v1407_v17 = vld [vmem:[#allocation2 + $0x154] sm:$0xf] }
  0x2c   :  { %566 = vmatpush.bf16.msrb.mxu0 %v1003_v31  ;;  %v1239_v10 = vor.u32 %v1425_v8, %v1236_v9  ;;  %v1373_v11 = vld [vmem:[#allocation2 + $0x44] sm:$0xf]  ;;  %v1028_v12 = vld [vmem:[#allocation2 + $0x48] sm:$0xf0]  ;;  %v1164_v18 = vld [vmem:[#allocation2 + $0x158] sm:$0xf0] }
  0x2d   :  { %579 = vmatpush.bf16.msrb.mxu1 %v1067_v34  ;;  %v1389_v13 = vld [vmem:[#allocation2 + $0xc4] sm:$0xf]  ;;  %v1031_v14 = vor.u32 %v1373_v11, %v1028_v12  ;;  %v1092_v15 = vld [vmem:[#allocation2 + $0xc8] sm:$0xf0]  ;;  %v1423_v19 = vld [vmem:[#allocation2 + $0x1d4] sm:$0xf]  ;;  %v1167_v20 = vor.u32 %v1407_v17, %v1164_v18 }
  0x2e   :  { %592 = vmatpush.bf16.msrb.mxu2 %v1131_v36  ;;  %605 = vmatpush.bf16.msrb.mxu3 %v1195_v40  ;;  %v1095_v16 = vor.u32 %v1389_v13, %v1092_v15  ;;  %v1228_v21 = vld [vmem:[#allocation2 + $0x1d8] sm:$0xf0]  ;;  %v1371_v23 = vld [vmem:[#allocation2 + $0x34] sm:$0xf]  ;;  %v1405_v29 = vld [vmem:[#allocation2 + $0x144] sm:$0xf] }
  0x2f   :  { %v1231_v22 = vor.u32 %v1423_v19, %v1228_v21  ;;  %v1020_v24 = vld [vmem:[#allocation2 + $0x38] sm:$0xf0]  ;;  %v1387_v26 = vld [vmem:[#allocation2 + $0xb4] sm:$0xf]  ;;  %v1156_v30 = vld [vmem:[#allocation2 + $0x148] sm:$0xf0] }
  0x30   :  { %567 = vmatpush.bf16.msrb.mxu0 %v995_v44  ;;  %v1023_v25 = vor.u32 %v1371_v23, %v1020_v24  ;;  %v1084_v27 = vld [vmem:[#allocation2 + $0xb8] sm:$0xf0]  ;;  %v1421_v31 = vld [vmem:[#allocation2 + $0x1c4] sm:$0xf]  ;;  %v1159_v32 = vor.u32 %v1405_v29, %v1156_v30  ;;  %v1220_v33 = vld [vmem:[#allocation2 + $0x1c8] sm:$0xf0] }
  0x31   :  { %580 = vmatpush.bf16.msrb.mxu1 %v1059_v48  ;;  %v1087_v28 = vor.u32 %v1387_v26, %v1084_v27  ;;  %v1223_v34 = vor.u32 %v1421_v31, %v1220_v33  ;;  %v1369_v35 = vld [vmem:[#allocation2 + $0x24] sm:$0xf]  ;;  %v1012_v36 = vld [vmem:[#allocation2 + $0x28] sm:$0xf0]  ;;  %v1403_v41 = vld [vmem:[#allocation2 + $0x134] sm:$0xf] }
  0x32   :  { %593 = vmatpush.bf16.msrb.mxu2 %v1123_v55  ;;  %606 = vmatpush.bf16.msrb.mxu3 %v1187_v58  ;;  %v1385_v37 = vld [vmem:[#allocation2 + $0xa4] sm:$0xf]  ;;  %v1015_v38 = vor.u32 %v1369_v35, %v1012_v36  ;;  %v1076_v39 = vld [vmem:[#allocation2 + $0xa8] sm:$0xf0]  ;;  %v1148_v42 = vld [vmem:[#allocation2 + $0x138] sm:$0xf0] }
  0x33   :  { %v1079_v40 = vor.u32 %v1385_v37, %v1076_v39  ;;  %v1419_v43 = vld [vmem:[#allocation2 + $0x1b4] sm:$0xf]  ;;  %v1151_v44 = vor.u32 %v1403_v41, %v1148_v42  ;;  %v1212_v45 = vld [vmem:[#allocation2 + $0x1b8] sm:$0xf0]  ;;  %v1140_v53 = vld [vmem:[#allocation2 + $0x128] sm:$0xf0] }
  0x34   :  { %612 = vmatpush.bf16.msra.mxu0 %v1055_v49  ;;  %v1215_v46 = vor.u32 %v1419_v43, %v1212_v45  ;;  %v1367_v47 = vld [vmem:[#allocation2 + $0x14] sm:$0xf]  ;;  %v1004_v48 = vld [vmem:[#allocation2 + $0x18] sm:$0xf0]  ;;  %v1417_v56 = vld [vmem:[#allocation2 + $0x1a4] sm:$0xf] }
  0x35   :  { %625 = vmatpush.bf16.msra.mxu1 %v1119_v52  ;;  %v1383_v49 = vld [vmem:[#allocation2 + $0x94] sm:$0xf]  ;;  %v1007_v50 = vor.u32 %v1367_v47, %v1004_v48  ;;  %v1068_v51 = vld [vmem:[#allocation2 + $0x98] sm:$0xf0]  ;;  %v1401_v52 = vld [vmem:[#allocation2 + $0x124] sm:$0xf] }
  0x36   :  { %638 = vmatpush.bf16.msra.mxu2 %v1183_v59  ;;  %651 = vmatpush.bf16.msra.mxu3 %v1247_v60  ;;  %v1071_v54 = vor.u32 %v1383_v49, %v1068_v51  ;;  %v1143_v55 = vor.u32 %v1401_v52, %v1140_v53  ;;  %v1204_v57 = vld [vmem:[#allocation2 + $0x1a8] sm:$0xf0]  ;;  %v1365_v58 = vld [vmem:[#allocation2 + $0x4] sm:$0xf]  ;;  %v1399_v1 = vld [vmem:[#allocation2 + $0x114] sm:$0xf] }
  0x37   :  { %v1207_v59 = vor.u32 %v1417_v56, %v1204_v57  ;;  %v996_v60 = vld [vmem:[#allocation2 + $0x8] sm:$0xf0]  ;;  %v1415_v3 = vld [vmem:[#allocation2 + $0x194] sm:$0xf]  ;;  %v1196_v5 = vld [vmem:[#allocation2 + $0x198] sm:$0xf0] }
  0x38   :  { %613 = vmatpush.bf16.msra.mxu0 %v1047_v61  ;;  %v1381_v61 = vld [vmem:[#allocation2 + $0x84] sm:$0xf]  ;;  %v999_v63 = vor.u32 %v1365_v58, %v996_v60  ;;  %v1199_v6 = vor.u32 %v1415_v3, %v1196_v5  ;;  %v1124_v8 = vld [vmem:[#allocation2 + $0x108] sm:$0xf0]  ;;  %v76_v12 = vld [vmem:[%s1677_s2] sm:$0xf] }
  0x39   :  { %626 = vmatpush.bf16.msra.mxu1 %v1111_v62  ;;  %v1060_v62 = vld [vmem:[#allocation2 + $0x88] sm:$0xf0]  ;;  %v1413_v9 = vld [vmem:[#allocation2 + $0x184] sm:$0xf]  ;;  %v79_v15 = vperm.slane %v76_v12, 1  ;;  %v1436_v23 = vld [vmem:[#allocation4 + $0x38] sm:$0xff] }
  0x3a   :  { %639 = vmatpush.bf16.msra.mxu2 %v1175_v7  ;;  %652 = vmatpush.bf16.msra.mxu3 %v1239_v10  ;;  %v1063_v0 = vor.u32 %v1381_v61, %v1060_v62  ;;  %v1397_v7 = vld [vmem:[#allocation2 + $0x104] sm:$0xf]  ;;  %v1188_v11 = vld [vmem:[#allocation2 + $0x188] sm:$0xf0]  ;;  %v1435_v31 = vld [vmem:[#allocation4 + $0x30] sm:$0xff]  ;;  %vm964_vm2 = vcmask 23552  }
  0x3b   :  { %v1127_v10 = vor.u32 %v1397_v7, %v1124_v8  ;;  %v1191_v13 = vor.u32 %v1413_v9, %v1188_v11  ;;  %v1434_v37 = vld [vmem:[#allocation4 + $0x28] sm:$0xff]  ;;  %v1433_v41 = vld [vmem:[#allocation4 + $0x20] sm:$0xff]  ;;  %v1444_v42 = vld [vmem:[#allocation4 + $0x78] sm:$0xff] }
  0x3c   :  { %614 = vmatpush.bf16.msra.mxu0 %v1039_v2  ;;  %v1132_v2 = vld [vmem:[#allocation2 + $0x118] sm:$0xf0]  ;;  %v1443_v45 = vld [vmem:[#allocation4 + $0x70] sm:$0xff]  ;;  %v1442_v47 = vld [vmem:[#allocation4 + $0x68] sm:$0xff] }
  0x3d   :  { %627 = vmatpush.bf16.msra.mxu1 %v1103_v4  ;;  %v1135_v4 = vor.u32 %v1399_v1, %v1132_v2  ;;  %v1432_v43 = vld [vmem:[#allocation4 + $0x18] sm:$0xff]  ;;  %v1429_v48 = vld [vmem:[#allocation4] sm:$0xff]  ;;  %v1439_v51 = vld [vmem:[#allocation4 + $0x50] sm:$0xff] }
  0x3e   :  { %640 = vmatpush.bf16.msra.mxu2 %v1167_v20  ;;  %653 = vmatpush.bf16.msra.mxu3 %v1231_v22  ;;  %v80_v22 = vperm.slane %v76_v12, 2  ;;  %v1441_v49 = vld [vmem:[#allocation4 + $0x60] sm:$0xff]  ;;  %v1438_v52 = vld [vmem:[#allocation4 + $0x48] sm:$0xff]  ;;  %v1451_v61 = vld [vmem:[%s1682_s7 + $0x30] sm:$0xff] }
  0x3f   :  { %v234_v53 = vld [vmem:[%s1679_s4] sm:$0x3] }
  0x40   :  { %615 = vmatpush.bf16.msra.mxu0 %v1031_v14  ;;  %v78_v14 = vperm.slane %v76_v12, 0  ;;  %v236_v56 = vperm.slane %v234_v53, 0  ;;  %v1437_v57 = vld [vmem:[#allocation4 + $0x40] sm:$0xff]  ;;  %v237_v8 = vperm.slane %v234_v53, 1 }
  0x41   :  { %628 = vmatpush.bf16.msra.mxu1 %v1095_v16 }
  0x42   :  { %641 = vmatpush.bf16.msra.mxu2 %v1159_v32  ;;  %654 = vmatpush.bf16.msra.mxu3 %v1223_v34 }
  0x44   :  { %616 = vmatpush.bf16.msra.mxu0 %v1023_v25  ;;  %v81_v25 = vperm.slane %v76_v12, 3 }
  0x45   :  { %629 = vmatpush.bf16.msra.mxu1 %v1087_v28 }
  0x46   :  { %642 = vmatpush.bf16.msra.mxu2 %v1151_v44  ;;  %655 = vmatpush.bf16.msra.mxu3 %v1215_v46  ;;  %v1431_v44 = vld [vmem:[#allocation4 + $0x10] sm:$0xff]  ;;  %v1430_v46 = vld [vmem:[#allocation4 + $0x8] sm:$0xff] }
  0x48   :  { %617 = vmatpush.bf16.msra.mxu0 %v1015_v38 }
  0x49   :  { %630 = vmatpush.bf16.msra.mxu1 %v1079_v40 }
  0x4a   :  { %643 = vmatpush.bf16.msra.mxu2 %v1143_v55  ;;  %656 = vmatpush.bf16.msra.mxu3 %v1207_v59  ;;  %v1452_v59 = vld [vmem:[%s1682_s7 + $0x38] sm:$0xff] }
  0x4c   :  { %618 = vmatpush.bf16.msra.mxu0 %v1007_v50  ;;  %v1440_v50 = vld [vmem:[#allocation4 + $0x58] sm:$0xff] }
  0x4d   :  { %631 = vmatpush.bf16.msra.mxu1 %v1071_v54 }
  0x4e   :  { %644 = vmatpush.bf16.msra.mxu2 %v1135_v4  ;;  %657 = vmatpush.bf16.msra.mxu3 %v1199_v6 }
  0x50   :  { %619 = vmatpush.bf16.msra.mxu0 %v999_v63 }
  0x51   :  { %632 = vmatpush.bf16.msra.mxu1 %v1063_v0 }
  0x52   :  { %645 = vmatpush.bf16.msra.mxu2 %v1127_v10  ;;  %658 = vmatpush.bf16.msra.mxu3 %v1191_v13 }
  0x90   :  { %v119_v16 = vpop.f32.mrf.mxu0  ;;  %v132_v18 = vpop.f32.mrf.mxu1 }
  0x91   :  { %v120_v17 = vadd.f32 %v119_v16, %v78_v14  ;;  %v133_v19 = vadd.f32 %v132_v18, %v79_v15 }
  0x93   :  { %v162_v20 = vmax.f32 %v120_v17, 0.0  ;;  %v163_v21 = vmax.f32 %v133_v19, 0.0 }
  0x95   :  { %v166_v24 = vpack.c.bf16 %v162_v20, %v162_v20  ;;  %v167_v26 = vpack.c.bf16 %v163_v21, %v163_v21 }
  0x97   :  { %v145_v27 = vpop.f32.mrf.mxu2  ;;  %568 = vmatmul.bf16.vlgmr.msrb.gmra.mxu0 %v166_v24  ;;  %581 = vmatmul.bf16.vlgmr.msrb.gmra.mxu1 %v167_v26 }
  0x98   :  { %v146_v28 = vadd.f32 %v145_v27, %v80_v22  ;;  %v158_v29 = vpop.f32.mrf.mxu3  ;;  %v121_v30 = vpop.f32.mrf.mxu0  ;;  %800 = vmatpush.bf16.msrb.mxu0 %v1436_v23  ;;  %813 = vmatpush.bf16.msrb.mxu1 %v1444_v42  ;;  %v1450_v23 = vld [vmem:[%s1682_s7 + $0x28] sm:$0xff]  ;;  %v1464_v42 = vld [vmem:[%s1683_s8] ss:$0 sm:$0xff] }
  0x99   :  { %v159_v32 = vadd.f32 %v158_v29, %v81_v25  ;;  %v134_v33 = vpop.f32.mrf.mxu1  ;;  %v1448_v25 = vld [vmem:[%s1682_s7 + $0x18] sm:$0xff]  ;;  %v1446_v27 = vld [vmem:[%s1682_s7 + $0x8] sm:$0xff]  ;;  %v1455_v30 = vld [vmem:[%s1684_s9 + $0x10] sm:$0xff] }
  0x9a   :  { %v164_v34 = vmax.f32 %v146_v28, 0.0  ;;  %v1445_v28 = vld [vmem:[%s1682_s7] sm:$0xff]  ;;  %v1456_v29 = vld [vmem:[%s1684_s9 + $0x18] sm:$0xff] }
  0x9b   :  { %v165_v35 = vmax.f32 %v159_v32, 0.0 }
  0x9c   :  { %v168_v36 = vpack.c.bf16 %v164_v34, %v164_v34  ;;  %801 = vmatpush.bf16.msrb.mxu0 %v1435_v31  ;;  %814 = vmatpush.bf16.msrb.mxu1 %v1443_v45  ;;  %v1454_v31 = vld [vmem:[%s1684_s9 + $0x8] sm:$0xff]  ;;  %v1463_v34 = vld [vmem:[%s1681_s6] ss:$0 sm:$0xff] }
  0x9d   :  { %v169_v38 = vpack.c.bf16 %v165_v35, %v165_v35 }
  0x9e   :  { %594 = vmatmul.bf16.vlgmr.msrb.gmra.mxu2 %v168_v36 }
  0x9f   :  { %607 = vmatmul.bf16.vlgmr.msrb.gmra.mxu3 %v169_v38  ;;  %v147_v39 = vpop.f32.mrf.mxu2  ;;  %896 = vmatpush.bf16.msrb.mxu2 %v1452_v59 }
  0xa0   :  { %v160_v40 = vpop.f32.mrf.mxu3  ;;  %802 = vmatpush.bf16.msrb.mxu0 %v1434_v37  ;;  %815 = vmatpush.bf16.msrb.mxu1 %v1442_v47 }
  0xa1   :  { %955 = vmatpush.bf16.msrb.mxu3 %v1456_v29 }
  0xa3   :  { %897 = vmatpush.bf16.msrb.mxu2 %v1451_v61 }
  0xa4   :  { %803 = vmatpush.bf16.msrb.mxu0 %v1433_v41  ;;  %816 = vmatpush.bf16.msrb.mxu1 %v1441_v49  ;;  %v1453_v41 = vld [vmem:[%s1684_s9] sm:$0xff] }
  0xa5   :  { %956 = vmatpush.bf16.msrb.mxu3 %v1455_v30 }
  0xa7   :  { %620 = vmatmul.bf16.vlgmr.msra.gmra.mxu0 %v166_v24  ;;  %633 = vmatmul.bf16.vlgmr.msra.gmra.mxu1 %v167_v26  ;;  %v1449_v24 = vld [vmem:[%s1682_s7 + $0x20] sm:$0xff]  ;;  %v1447_v26 = vld [vmem:[%s1682_s7 + $0x10] sm:$0xff] }
  0xa8   :  { %804 = vmatpush.bf16.msrb.mxu0 %v1432_v43  ;;  %817 = vmatpush.bf16.msrb.mxu1 %v1440_v50 }
  0xa9   :  { %898 = vmatpush.bf16.msrb.mxu2 %v1450_v23  ;;  %957 = vmatpush.bf16.msrb.mxu3 %v1454_v31 }
  0xac   :  { %805 = vmatpush.bf16.msrb.mxu0 %v1431_v44  ;;  %818 = vmatpush.bf16.msrb.mxu1 %v1439_v51 }
  0xad   :  { %899 = vmatpush.bf16.msrb.mxu2 %v1449_v24  ;;  %958 = vmatpush.bf16.msrb.mxu3 %v1453_v41 }
  0xae   :  { %646 = vmatmul.bf16.vlgmr.msra.gmra.mxu2 %v168_v36 }
  0xaf   :  { %659 = vmatmul.bf16.vlgmr.msra.gmra.mxu3 %v169_v38 }
  0xb0   :  { %806 = vmatpush.bf16.msrb.mxu0 %v1430_v46  ;;  %819 = vmatpush.bf16.msrb.mxu1 %v1438_v52 }
  0xb1   :  { %900 = vmatpush.bf16.msrb.mxu2 %v1448_v25 }
  0xb4   :  { %807 = vmatpush.bf16.msrb.mxu0 %v1429_v48  ;;  %820 = vmatpush.bf16.msrb.mxu1 %v1437_v57  ;;  %v1465_v48 = vld [vmem:[%s1685_s10] ss:$0 sm:$0xff] }
  0xb5   :  { %901 = vmatpush.bf16.msrb.mxu2 %v1447_v26 }
  0xb9   :  { %902 = vmatpush.bf16.msrb.mxu2 %v1446_v27 }
  0xbd   :  { %903 = vmatpush.bf16.msrb.mxu2 %v1445_v28 }
 0x114   :  { %v569_v54 = vpop.f32.mrf.mxu0  ;;  %v582_v55 = vpop.f32.mrf.mxu1 }
 0x115   :  { %v570_v58 = vadd.f32 %v569_v54, %v236_v56 }
 0x117   :  { %v583_v63 = vadd.f32 %v582_v55, %v570_v58 }
 0x11c   :  { %v571_v60 = vpop.f32.mrf.mxu0  ;;  %v584_v62 = vpop.f32.mrf.mxu1 }
 0x121   :  { %v595_v0 = vpop.f32.mrf.mxu2 }
 0x122   :  { %v596_v1 = vadd.f32 %v595_v0, %v583_v63  ;;  %v608_v2 = vpop.f32.mrf.mxu3 }
 0x124   :  { %v609_v3 = vadd.f32 %v608_v2, %v596_v1  ;;  %v621_v4 = vpop.f32.mrf.mxu0  ;;  %v634_v5 = vpop.f32.mrf.mxu1 }
 0x125   :  { %v622_v11 = vadd.f32 %v621_v4, %v237_v8 }
 0x126   :  { %v664_v6 = vmax.f32 %v609_v3, 0.0 }
 0x127   :  { %v635_v14 = vadd.f32 %v634_v5, %v622_v11 }
 0x128   :  { %v666_v7 = vpack.c.bf16 %v664_v6, %v664_v6 }
 0x129   :  { %v597_v9 = vpop.f32.mrf.mxu2 }
 0x12a   :  { %v610_v10 = vpop.f32.mrf.mxu3  ;;  %808 = vmatmul.bf16.vlgmr.msrb.gmra.mxu0 %v666_v7 }
 0x12c   :  { %v623_v12 = vpop.f32.mrf.mxu0  ;;  %v636_v13 = vpop.f32.mrf.mxu1 }
 0x131   :  { %v647_v15 = vpop.f32.mrf.mxu2 }
 0x132   :  { %v648_v16 = vadd.f32 %v647_v15, %v635_v14  ;;  %v660_v17 = vpop.f32.mrf.mxu3 }
 0x134   :  { %v661_v18 = vadd.f32 %v660_v17, %v648_v16 }
 0x136   :  { %v665_v19 = vmax.f32 %v661_v18, 0.0 }
 0x138   :  { %v667_v20 = vpack.c.bf16 %v665_v19, %v665_v19 }
 0x139   :  { %v649_v21 = vpop.f32.mrf.mxu2 }
 0x13a   :  { %v662_v22 = vpop.f32.mrf.mxu3  ;;  %821 = vmatmul.bf16.vlgmr.msrb.gmra.mxu1 %v667_v20 }
 0x1a7   :  { %v809_v32 = vpop.f32.mrf.mxu0 }
 0x1a8   :  { %v810_v35 = vadd.f32 %v1463_v34, %v809_v32 }
 0x1af   :  { %v811_v33 = vpop.f32.mrf.mxu0 }
 0x1b7   :  { %v822_v36 = vpop.f32.mrf.mxu1 }
 0x1b8   :  { %v823_v37 = vadd.f32 %v822_v36, %v810_v35 }
 0x1ba   :  { %v826_v38 = vmax.f32 %v823_v37, 0.0 }
 0x1bc   :  { %v827_v39 = vpack.c.bf16 %v826_v38, %v826_v38 }
 0x1be   :  { %904 = vmatmul.bf16.vlgmr.msrb.gmra.mxu2 %v827_v39 }
 0x1bf   :  { %v824_v40 = vpop.f32.mrf.mxu1 }
 0x241   :  { %v905_v43 = vpop.f32.mrf.mxu2 }
 0x242   :  { %v906_v44 = vadd.f32 %v1464_v42, %v905_v43 }
 0x244   :  { %v909_v45 = vmax.f32 %v906_v44, 0.0 }
 0x246   :  { %v910_v46 = vpack.c.bf16 %v909_v45, %v909_v45 }
 0x248   :  { %1360 = vmatmul.msk.bf16.vlgmr.msrb.gmra.mxu3 %vm947_vm1, %v910_v46 }
 0x249   :  { %v907_v47 = vpop.f32.mrf.mxu2 }
 0x2cb   :  { %v960_v49 = vpop.f32.mrf.mxu3 }
 0x2cc   :  { %v961_v50 = vadd.f32 %v1465_v48, %v960_v49 }
 0x2ce   :  { %965 = vst.msk [vmem:[%s1686_s11] sm:$0xff] %vm964_vm2, %v961_v50 }
 0x2d3   :  { %v962_v51 = vpop.f32.mrf.mxu3 }
 0x2d4   :  { %970 = vsyncpa [#allocation3], 1 }
 0x2d5   :  { %971 = vsyncpa [#allocation5], 1 }

</bundles_post_ra>
